<compile_context>
chip_gen: v7x
topology: tpu7x:2x2x1
jax: 0.10.0
libtpu: 0.0.40
codegen_flags: <defaults>
</compile_context>

<pallas_src>
import jax
import jax.numpy as jnp
from jax.experimental import pallas as pl
from jax.experimental.pallas import tpu as pltpu

_SUBLANE = 8
_MAX_TB = 2048                     # batch-tile cap (rows)
_BUFFER1_WEIGHT_BYTES = 4 << 20    # single-buffer constant weights above this


def _round_up(n, m):
    return ((n + m - 1) // m) * m


def _vmem_capacity_bytes():
    try:
        return int(pltpu.get_tpu_info().vmem_capacity_bytes)
    except Exception:
        return 64 * 1024 * 1024    # conservative fallback (v7x per-core VMEM)


def _make_fan_kernel(out_fourier, out_linear):
    def kernel(x_ref, w_ref, bl_ref, o_ref):
        # One wide MXU matmul covering both the Fourier and the linear branch,
        # f32 accumulation regardless of the input dtype (bf16 or f32).
        y = jnp.dot(x_ref[...], w_ref[...], preferred_element_type=jnp.float32)
        f = y[:, 0:out_fourier]
        lin = jnp.maximum(y[:, out_fourier:out_fourier + out_linear] + bl_ref[...], 0.0)
        # phi = [cos | sin | relu-linear], written directly in its final,
        # unpadded layout (masked stores for narrow segments).
        o_ref[:, 0:out_fourier] = jnp.cos(f).astype(o_ref.dtype)
        o_ref[:, out_fourier:2 * out_fourier] = jnp.sin(f).astype(o_ref.dtype)
        o_ref[:, 2 * out_fourier:2 * out_fourier + out_linear] = lin.astype(o_ref.dtype)
    return kernel


def fan_layer_prepare(weight_linear, bias_linear, weight_fourier):
    """One-time parameter packing (cache this; do NOT call per step).

    Fuses the Fourier and linear weights into a single (inFeatures,
    outFourier + outLinear) matrix so the kernel issues one MXU dot.  Weights
    keep their dtype (use bf16 params with bf16 activations); the bias stays
    f32 because it is added to the f32 accumulator inside the kernel.
    """
    out_linear, in_features = weight_linear.shape
    out_fourier, in_f = weight_fourier.shape
    assert in_f == in_features, "weightFourier / weightLinear inFeatures mismatch"
    w_cat = jnp.concatenate([weight_fourier.T, weight_linear.T], axis=1)
    bl = bias_linear.reshape(1, out_linear).astype(jnp.float32)
    return w_cat, bl, out_fourier, out_linear


def _pick_batch_tile(batch, in_features, out_total, io_bytes, resident_bytes):
    """Largest batch tile keeping double-buffered x/phi tiles plus the resident
    weights within VMEM, preferring >=2 grid steps when the batch allows."""
    vmem = _vmem_capacity_bytes()
    budget = int(vmem * 0.7) - resident_bytes            # guard: may be negative
    per_row = 2 * io_bytes * (in_features + out_total)   # x + phi, double buffered
    tb = budget // per_row if budget > 0 else _SUBLANE
    tb = max(_SUBLANE, min(int(tb), _MAX_TB))
    # v7x has 2 TensorCores: prefer at least two "parallel" grid steps.
    if tb >= batch and batch >= 4 * _SUBLANE:
        tb = _round_up((batch + 1) // 2, _SUBLANE)
    if tb >= batch:
        return batch                        # single full-extent tile (any size legal)
    return (tb // _SUBLANE) * _SUBLANE      # multiple of 8; last tile may be partial


def fan_layer_apply(x, w_cat, bl, out_fourier, out_linear):
    batch, in_features = x.shape
    out_total = 2 * out_fourier + out_linear
    out_dtype = x.dtype
    io_bytes = jnp.dtype(x.dtype).itemsize

    w_bytes = w_cat.size * w_cat.dtype.itemsize
    b_bytes = bl.size * bl.dtype.itemsize

    # Constant blocks (index_map == (0, 0)): single-buffer when large to halve
    # their resident VMEM; keep the default for tiny weights.
    if w_bytes >= _BUFFER1_WEIGHT_BYTES:
        const_kwargs = dict(pipeline_mode=pl.Buffered(1))
        n_w_bufs = 1
    else:
        const_kwargs = {}
        n_w_bufs = 2
    # TODO(synk): if n_w_bufs * w_bytes approaches ~half of VMEM (huge inFeatures
    # on v7x), add a weight-column grid axis and tile the fused weight along N.

    resident = n_w_bufs * (w_bytes + b_bytes)
    tb = _pick_batch_tile(batch, in_features, out_total, io_bytes, resident)
    grid = (pl.cdiv(batch, tb),)

    vmem_cap = _vmem_capacity_bytes()
    vmem_need = (resident
                 + 2 * tb * in_features * io_bytes     # x tile, double buffered
                 + 2 * tb * out_total * io_bytes       # phi tile, double buffered
                 + (2 << 20))                          # compiler scratch headroom
    vmem_limit = int(min(max(vmem_need, 32 << 20), int(vmem_cap * 0.9)))

    w_spec = pl.BlockSpec((in_features, out_fourier + out_linear),
                          lambda i: (0, 0), **const_kwargs)
    b_spec = pl.BlockSpec((1, out_linear), lambda i: (0, 0), **const_kwargs)

    return pl.pallas_call(
        _make_fan_kernel(out_fourier, out_linear),
        out_shape=jax.ShapeDtypeStruct((batch, out_total), out_dtype),
        grid=grid,
        in_specs=[
            pl.BlockSpec((tb, in_features), lambda i: (i, 0)),
            w_spec,
            b_spec,
        ],
        out_specs=pl.BlockSpec((tb, out_total), lambda i: (i, 0)),
        compiler_params=pltpu.CompilerParams(
            dimension_semantics=("parallel",),
            vmem_limit_bytes=vmem_limit,
        ),
    )(x, w_cat, bl)


def fan_layer(x, weight_linear, bias_linear, weight_fourier):
    """Convenience wrapper.  In hot loops call fan_layer_prepare once and reuse
    the packed params with fan_layer_apply (or jit so packing constant-folds)."""
    packed = fan_layer_prepare(weight_linear, bias_linear, weight_fourier)
    return fan_layer_apply(x, *packed)


if __name__ == "__main__":
    # Small shapes consistent with the module's forward (x: (B, inFeatures)).
    B, in_features, out_fourier, out_linear = 8, 32, 16, 16

    key = jax.random.PRNGKey(0)
    kx, kwl, kbl, kwf = jax.random.split(key, 4)

    # Use bf16-exact f32 values so the correctness check is independent of how
    # the MXU decomposes the f32 matmul (products are then exact on any path).
    def q(a):
        return a.astype(jnp.bfloat16).astype(jnp.float32)

    x = q(jax.random.normal(kx, (B, in_features), dtype=jnp.float32))
    weight_linear = q(jax.random.normal(kwl, (out_linear, in_features), dtype=jnp.float32))
    bias_linear = q(jax.random.normal(kbl, (out_linear,), dtype=jnp.float32))
    weight_fourier = q(jax.random.normal(kwf, (out_fourier, in_features), dtype=jnp.float32))

    # Pack once (outside the hot loop), then run the kernel.
    w_cat, bl, of, ol = fan_layer_prepare(weight_linear, bias_linear, weight_fourier)
    phi = fan_layer_apply(x, w_cat, bl, of, ol)
    phi = jax.block_until_ready(phi)

    # Pure-JAX reference with the same semantics as the PyTorch forward.
    lin_ref = jnp.maximum(x @ weight_linear.T + bias_linear, 0.0)
    f_ref = x @ weight_fourier.T
    phi_ref = jnp.concatenate([jnp.cos(f_ref), jnp.sin(f_ref), lin_ref], axis=1)

    assert phi.shape == (B, 2 * out_fourier + out_linear)
    assert phi.dtype == x.dtype
    assert jnp.allclose(phi, phi_ref, atol=1e-4, rtol=1e-4), float(
        jnp.max(jnp.abs(phi - phi_ref)))

    print("KERNEL_OK")
</pallas_src>

<mosaic_0001>
module attributes {stable_mosaic.version = 11 : i64} {
  func.func @kernel(%arg0: i32, %arg1: memref<8x32xf32, #tpu.memory_space<vmem>>, %arg2: memref<32x32xf32, #tpu.memory_space<vmem>>, %arg3: memref<1x16xf32, #tpu.memory_space<vmem>>, %arg4: memref<8x48xf32, #tpu.memory_space<vmem>>) attributes {dimension_semantics = [#tpu.dimension_semantics<parallel>], iteration_bounds = array<i64: 1>, scalar_prefetch = 0 : i64, scratch_operands = 0 : i64, tpu.core_type = #tpu.core_type<tc>, window_params = [{transform_indices = @transform_0, window_bounds = array<i64: 8, 32>}, {pipeline_mode = #tpu.pipeline_mode<synchronous>, transform_indices = @transform_1, window_bounds = array<i64: 32, 32>}, {pipeline_mode = #tpu.pipeline_mode<synchronous>, transform_indices = @transform_2, window_bounds = array<i64: 1, 16>}, {transform_indices = @transform_3, window_bounds = array<i64: 8, 48>}]} {
    %c0 = arith.constant 0 : index
    %c0_0 = arith.constant 0 : index
    %0 = vector.load %arg1[%c0, %c0_0] : memref<8x32xf32, #tpu.memory_space<vmem>>, vector<8x32xf32>
    %c0_1 = arith.constant 0 : index
    %c0_2 = arith.constant 0 : index
    %1 = vector.load %arg2[%c0_1, %c0_2] : memref<32x32xf32, #tpu.memory_space<vmem>>, vector<32x32xf32>
    %cst = arith.constant dense<0.000000e+00> : vector<8x32xf32>
    %2 = tpu.matmul %0, %1, %cst {dimension_numbers = #tpu.dot_dimension_numbers<[1], [0], [0], [1], [0, 0, 1, 1], [], []>} : vector<8x32xf32>, vector<32x32xf32>, vector<8x32xf32> -> vector<8x32xf32>
    %3 = vector.extract_strided_slice %2 {offsets = [0, 0], sizes = [8, 16], strides = [1, 1]} : vector<8x32xf32> to vector<8x16xf32>
    %4 = vector.extract_strided_slice %2 {offsets = [0, 16], sizes = [8, 16], strides = [1, 1]} : vector<8x32xf32> to vector<8x16xf32>
    %c0_3 = arith.constant 0 : index
    %c0_4 = arith.constant 0 : index
    %5 = vector.load %arg3[%c0_3, %c0_4] : memref<1x16xf32, #tpu.memory_space<vmem>>, vector<1x16xf32>
    %6 = vector.broadcast %5 : vector<1x16xf32> to vector<8x16xf32>
    %7 = arith.addf %4, %6 : vector<8x16xf32>
    %cst_5 = arith.constant 0.000000e+00 : f32
    %8 = vector.broadcast %cst_5 : f32 to vector<8x16xf32>
    %9 = arith.maximumf %7, %8 : vector<8x16xf32>
    %10 = math.cos %3 : vector<8x16xf32>
    %c0_6 = arith.constant 0 : index
    %c0_7 = arith.constant 0 : index
    %11 = vector.load %arg4[%c0_6, %c0_7] : memref<8x48xf32, #tpu.memory_space<vmem>>, vector<8x16xf32>
    tpu.vector_store %arg4[%c0_6, %c0_7], %10 {strides = array<i32>} : memref<8x48xf32, #tpu.memory_space<vmem>>, vector<8x16xf32>,
    %12 = math.sin %3 : vector<8x16xf32>
    %c0_8 = arith.constant 0 : index
    %c16 = arith.constant 16 : index
    %13 = vector.load %arg4[%c0_8, %c16] : memref<8x48xf32, #tpu.memory_space<vmem>>, vector<8x16xf32>
    tpu.vector_store %arg4[%c0_8, %c16], %12 {strides = array<i32>} : memref<8x48xf32, #tpu.memory_space<vmem>>, vector<8x16xf32>,
    %c0_9 = arith.constant 0 : index
    %c32 = arith.constant 32 : index
    %14 = vector.load %arg4[%c0_9, %c32] : memref<8x48xf32, #tpu.memory_space<vmem>>, vector<8x16xf32>
    tpu.vector_store %arg4[%c0_9, %c32], %9 {strides = array<i32>} : memref<8x48xf32, #tpu.memory_space<vmem>>, vector<8x16xf32>,
    return
  }
  func.func @transform_0(%arg0: i32) -> (i32, i32) {
    %c0_i32 = arith.constant 0 : i32
    %c0_i32_0 = arith.constant 0 : i32
    return %arg0, %c0_i32 : i32, i32
  }
  func.func @transform_1(%arg0: i32) -> (i32, i32) {
    %c0_i32 = arith.constant 0 : i32
    %c0_i32_0 = arith.constant 0 : i32
    %c0_i32_1 = arith.constant 0 : i32
    return %c0_i32, %c0_i32_0 : i32, i32
  }
  func.func @transform_2(%arg0: i32) -> (i32, i32) {
    %c0_i32 = arith.constant 0 : i32
    %c0_i32_0 = arith.constant 0 : i32
    %c0_i32_1 = arith.constant 0 : i32
    return %c0_i32, %c0_i32_0 : i32, i32
  }
  func.func @transform_3(%arg0: i32) -> (i32, i32) {
    %c0_i32 = arith.constant 0 : i32
    %c0_i32_0 = arith.constant 0 : i32
    return %arg0, %c0_i32 : i32, i32
  }
}

</mosaic_0001>

<bundles_post_ra>
// kernel: tpu_custom_call.1
= control target key start
LH: loop header
LB: loop body
LE: loop exit
PB: predicated region body
PF: predicated region fallthrough
CT: control target
= control target key end

     0   :  { %8 = vsyncpa [#allocation3], 0  ;;  %s602_s0 = inlined_call_operand.hbm [shape: f32[8,32], index: 0, kind: input, shape index: {}]   ;;  %s603_s1 = inlined_call_operand.hbm [shape: f32[32,32], index: 1, kind: input, shape index: {}]   ;;  %s604_s2 = inlined_call_operand.vmem [shape: f32[1,16], index: 2, kind: input, shape index: {}]   ;;  %s605_s3 = inlined_call_operand.hbm [shape: f32[8,48], index: 3, kind: output, shape index: {}]  }
   0x1   :  { %9 = vsyncpa [#allocation6], 0 }
   0x2   :  { %10 = vsyncpa [#allocation4], 0  ;;  %s495_s12 = smov [#allocation2]   ;;  %s496_s14 = smov [#allocation5]  }
   0x3   :  { %s17_s13 = sshll.u32 %s495_s12, 4  ;;  %s26_s15 = sshll.u32 %s496_s14, 4  ;;  %s18_s13 = int_to_ptr.vmem [resolvable:$true] %s17_s13  ;;  %s530_s15 = int_to_ptr.vmem [resolvable:$true] %s26_s15 }
   0x4   :  { %s423_s18 = scalar_lea.hbm %s602_s0, 128 }
   0x5   :  { %p424_p0 = scmp.ne.s32.totalorder %s602_s0, %s423_s18  ;;  %p427_p1 = scmp.lt.u32.totalorder %s423_s18, %s602_s0 }
   0x7   :  { %p429_p2 = pnand %p427_p1, %p424_p0 }
   0x9   :  { %432 = shalt.err (!%p429_p2)
}
   0xa   :  { %s433_s23 = scalar_lea.vmem %s18_s13, 128  ;;  %p438_p4 = scmp.lt.s32.totalorder %s18_s13, %s18_s13 }
   0xb   :  { %p434_p3 = scmp.ne.s32.totalorder %s18_s13, %s433_s23  ;;  %p439_p5 = scmp.lt.s32.totalorder %s433_s23, %s433_s23 }
   0xd   :  { %p440_p6 = por %p439_p5, %p438_p4 }
   0xf   :  { %p441_p7 = pnand %p440_p6, %p434_p3 }
  0x11   :  { %444 = shalt.err (!%p441_p7)
}
  0x12   :  { %20 = dma.hbm_to_vmem [thread:$0]  %s602_s0, 128, %s18_s13, [#allocation3]  }
  0x13   :  { %s445_s28 = scalar_lea.hbm %s603_s1, 512 }
  0x14   :  { %p446_p8 = scmp.ne.s32.totalorder %s603_s1, %s445_s28  ;;  %p449_p9 = scmp.lt.u32.totalorder %s445_s28, %s603_s1 }
  0x16   :  { %p451_p10 = pnand %p449_p9, %p446_p8 }
  0x18   :  { %454 = shalt.err (!%p451_p10)
}
  0x19   :  { %s455_s6 = scalar_lea.vmem %s530_s15, 512  ;;  %p460_p12 = scmp.lt.s32.totalorder %s530_s15, %s530_s15 }
  0x1a   :  { %p456_p11 = scmp.ne.s32.totalorder %s530_s15, %s455_s6  ;;  %p461_p13 = scmp.lt.s32.totalorder %s455_s6, %s455_s6 }
  0x1c   :  { %p462_p0 = por %p461_p13, %p460_p12 }
  0x1e   :  { %p463_p1 = pnand %p462_p0, %p456_p11 }
  0x20   :  { %466 = shalt.err (!%p463_p1)
}
  0x21   :  { %s497_s0 = smov 128   ;;  %s498_s7 = smov 8  }
  0x22   :  { %32 = dma.hbm_to_vmem [thread:$0]  %s603_s1, 512, %s530_s15, [#allocation6], %s497_s0, %s497_s0, %s498_s7  }
  0x23   :  { %489 = dma.done.wait [#allocation3], 128  }
  0x24   :  { %490 = vsyncadd [#allocation3], 4294967168 }
  0x25   :  { %491 = dma.done.wait [#allocation6], 512  }
  0x26   :  { %492 = vsyncadd [#allocation6], 4294966784  ;;  %v499_v0 = vmov 0.0|0.0   ;;  %vm500_vm0 = vmmov 0   ;;  %v501_v1 = vmov 0.0   ;;  %v42_v2 = vld [vmem:[#allocation5] sm:$0xff] }
  0x27   :  { %394 = vmatprep.subr.bf16.mxu0 %v499_v0  ;;  %391 = vmatprep.mubr.msk.f32.mxu0 %vm500_vm0, %v501_v1  ;;  %v43_v3 = vld [vmem:[#allocation5 + $0x8] sm:$0xff]  ;;  %v44_v4 = vld [vmem:[#allocation5 + $0x10] sm:$0xff]  ;;  %v45_v6 = vld [vmem:[#allocation5 + $0x18] sm:$0xff]  ;;  %s502_s12 = smov 16   ;;  %vm46_vm1 = vcmask 261120   ;;  %vm234_vm12 = vcmask 130048  }
  0x28   :  { %v395_v5 = vpack.c.bf16 %v43_v3, %v42_v2  ;;  %v369_v7 = vld [vmem:[%s604_s2] ss:$0 sm:$0xff]  ;;  %v398_v8 = vpack.c.bf16 %v45_v6, %v44_v4  ;;  %v503_v25 = vmov 683565275   ;;  %v504_v27 = vmov 2475754826  }
  0x29   :  { %126 = vrot.lane.b32.xlu0 %v369_v7, %s502_s12  ;;  %v41_v9 = vld [vmem:[#allocation2] sm:$0xff]  ;;  %v505_v30 = vmov 2131351028   ;;  %v506_v33 = vmov 2102212464   ;;  %s509_s1 = smov [#allocation7]  }
  0x2a   :  { %396 = vmatpush3.bf16.msra.mxu0 %v395_v5  ;;  %v507_v36 = vmov 920167782   ;;  %v508_v39 = vmov 1326507024   ;;  %s358_s2 = sshll.u32 %s509_s1, 4  ;;  %s359_s2 = int_to_ptr.vmem [resolvable:$true] %s358_s2 }
  0x2b   :  { %397 = vmatprep.subr.bf16.mxu0 %v499_v0  ;;  %s467_s13 = scalar_lea.vmem %s359_s2, 128  ;;  %p472_p3 = scmp.lt.s32.totalorder %s359_s2, %s359_s2 }
  0x2c   :  { %p468_p2 = scmp.ne.s32.totalorder %s359_s2, %s467_s13  ;;  %p473_p4 = scmp.lt.s32.totalorder %s467_s13, %s467_s13 }
  0x2e   :  { %399 = vmatpush3.bf16.msra.mxu0 %v398_v8  ;;  %p474_p5 = por %p473_p4, %p472_p3 }
  0x30   :  { %p475_p6 = pnand %p474_p5, %p468_p2 }
  0x31   :  { %392 = vmatmul.mubr.msk.f32.vlgmr.msra.gmra.mrb[0].mxu0 %vm46_vm1, %v41_v9 }
  0x9b   :  { %v127_v10 = vpop.permute.xlu0 %126 }
 0x104   :  { %v565_v11 = vpop.f32.mrb[0].mxu0 }
 0x105   :  { %v134_v12 = vand.u32 2139095040, %v565_v11  ;;  %v393_v13 = vpop.f32.mrb[1].mxu0  ;;  %v129_v14 = vadd.f32 %v127_v10, %v565_v11  ;;  %v131_v19 = vand.u32 2147483647, %v565_v11  ;;  %vm133_vm9 = vcmp.lt.s32.totalorder %v565_v11, 0 }
 0x107   :  { %v135_v15 = vshrl.u32 %v134_v12, 23  ;;  %v130_v16 = vmax.f32 %v129_v14, 0.0  ;;  %v138_v22 = vand.u32 8388607, %v131_v19  ;;  %vm132_vm10 = vcmp.le.f32.partialorder %v131_v19, 0.7853982 }
 0x109   :  { %v370_v17 = vadd.s32 4294967169, %v135_v15  ;;  %347 = vrot.lane.b32.xlu1 %v130_v16, %s502_s12  ;;  %v139_v41 = vor.u32 8388608, %v138_v22 }
 0x10b   :  { %v141_v18 = vadd.s32 1, %v370_v17  ;;  %v179_v55 = vshll.u32 %v139_v41, 8 }
 0x10d   :  { %vm142_vm2 = vcmp.gt.s32.totalorder %v141_v18, 0 }
 0x10e   :  { %v143_v20 = vsel %vm142_vm2, %v141_v18, 0  ;;  %vm223_vm2 = vweird.f32 %v565_v11 }
 0x10f   :  { %v145_v21 = vand.u32 31, %v143_v20  ;;  %v144_v24 = vshrl.u32 %v143_v20, 5 }
 0x111   :  { %v146_v23 = vsub.s32 32, %v145_v21  ;;  %v148_v26 = vshll.u32 %v503_v25, %v145_v21  ;;  %v151_v28 = vshll.u32 %v504_v27, %v145_v21  ;;  %v154_v32 = vshll.u32 %v505_v30, %v145_v21 }
 0x112   :  { %v157_v35 = vshll.u32 %v506_v33, %v145_v21  ;;  %v160_v38 = vshll.u32 %v507_v36, %v145_v21  ;;  %vm163_vm3 = vcmp.lt.s32.totalorder %v144_v24, 1  ;;  %vm166_vm4 = vcmp.lt.s32.totalorder %v144_v24, 4 }
 0x113   :  { %v149_v29 = vshrl.u32 %v504_v27, %v146_v23  ;;  %v152_v31 = vshrl.u32 %v505_v30, %v146_v23  ;;  %v155_v34 = vshrl.u32 %v506_v33, %v146_v23  ;;  %v158_v37 = vshrl.u32 %v507_v36, %v146_v23 }
 0x114   :  { %v161_v40 = vshrl.u32 %v508_v39, %v146_v23  ;;  %v147_v50 = vshrl.u32 %v503_v25, %v146_v23  ;;  %vm165_vm5 = vcmp.lt.s32.totalorder %v144_v24, 3  ;;  %vm164_vm6 = vcmp.lt.s32.totalorder %v144_v24, 2 }
 0x115   :  { %v150_v42 = vor.u32 %v149_v29, %v148_v26  ;;  %v153_v43 = vor.u32 %v152_v31, %v151_v28  ;;  %v156_v44 = vor.u32 %v155_v34, %v154_v32  ;;  %v159_v45 = vor.u32 %v158_v37, %v157_v35 }
 0x116   :  { %v162_v46 = vor.u32 %v161_v40, %v160_v38 }
 0x117   :  { %v168_v47 = vsel %vm166_vm4, %v156_v44, 2102212464  ;;  %v171_v48 = vsel %vm163_vm3, %v150_v42, %v153_v43  ;;  %v175_v49 = vsel %vm163_vm3, %v153_v43, %v156_v44  ;;  %v172_v51 = vsel %vm166_vm4, %v159_v45, 920167782 }
 0x118   :  { %v176_v52 = vsel %vm166_vm4, %v162_v46, 1326507024  ;;  %v173_v53 = vsel %vm165_vm5, %v156_v44, %v172_v51  ;;  %v167_v56 = vsel %vm163_vm3, %v147_v50, %v150_v42  ;;  %v169_v57 = vsel %vm165_vm5, %v153_v43, %v168_v47 }
 0x119   :  { %v177_v54 = vsel %vm165_vm5, %v159_v45, %v176_v52  ;;  %v174_v58 = vsel %vm164_vm6, %v171_v48, %v173_v53  ;;  %v170_v0 = vsel %vm164_vm6, %v167_v56, %v169_v57  ;;  %vm344_vm3 = vcmask 261248  }
 0x11a   :  { %v178_v59 = vsel %vm164_vm6, %v175_v49, %v177_v54  ;;  %v576_v62 = vmul.u32.u64.low %v179_v55, %v174_v58  ;;  %v577_v63 = vmul.u32.u64.high %v179_v55, %v174_v58, %v576_v62  ;;  %v186_v2 = vmul.u32 %v179_v55, %v170_v0 }
 0x11b   :  { %v573_v60 = vmul.u32.u64.low %v179_v55, %v178_v59  ;;  %v574_v61 = vmul.u32.u64.high %v179_v55, %v178_v59, %v573_v60  ;;  %vm350_vm4 = vcmask 392448  }
 0x11c   :  { %v189_v1 = vadd.s32 1, %v577_v63 }
 0x11d   :  { %vm188_vm7 = vc.u32 %v574_v61, %v576_v62  ;;  %v187_v15 = vadd.s32 %v576_v62, %v574_v61 }
 0x11e   :  { %v190_v3 = vsel %vm188_vm7, %v189_v1, %v577_v63 }
 0x11f   :  { %v191_v4 = vadd.s32 %v190_v3, %v186_v2 }
 0x121   :  { %v192_v5 = vadd.s32 536870912, %v191_v4 }
 0x123   :  { %v193_v6 = vshrl.u32 %v192_v5, 30 }
 0x125   :  { %v194_v7 = vshll.u32 %v193_v6, 30  ;;  %v217_v28 = vsub.s32 4, %v193_v6 }
 0x127   :  { %v195_v8 = vsub.s32 %v191_v4, %v194_v7  ;;  %v218_v31 = vsel %vm133_vm9, %v217_v28, %v193_v6 }
 0x128   :  { %v220_v33 = vsel %vm132_vm10, 0, %v218_v31 }
 0x129   :  { %v197_v9 = vsub.s32 0, %v195_v8  ;;  %v329_v34 = vadd.s32 3, %v220_v33  ;;  %v224_v35 = vand.u32 3, %v220_v33 }
 0x12b   :  { %v371_v10 = vmin.u32 %v197_v9, %v195_v8  ;;  %v330_v36 = vand.u32 3, %v329_v34  ;;  %vm229_vm11 = vcmp.eq.s32.totalorder %v224_v35, 2  ;;  %vm226_vm14 = vcmp.eq.s32.totalorder %v224_v35, 0 }
 0x12c   :  { %vm225_vm0 = vcmp.lt.s32.totalorder %v224_v35, 2 }
 0x12d   :  { %v199_v12 = vclz %v371_v10  ;;  %vm335_vm13 = vcmp.eq.s32.totalorder %v330_v36, 2  ;;  %vm332_vm15 = vcmp.eq.s32.totalorder %v330_v36, 0  ;;  %vm331_vm1 = vcmp.lt.s32.totalorder %v330_v36, 2 }
 0x12f   :  { %v372_v13 = vadd.s32 4294967294, %v199_v12 }
 0x131   :  { %vm373_vm8 = vcmp.lt.s32.totalorder %v372_v13, 0 }
 0x132   :  { %v202_v14 = vsel %vm373_vm8, 0, %v372_v13 }
 0x133   :  { %v203_v16 = vsub.s32 32, %v202_v14  ;;  %v207_v17 = vsub.s32 4294967266, %v202_v14  ;;  %v204_v18 = vshll.u32 %v195_v8, %v202_v14 }
 0x135   :  { %v205_v20 = vshrl.u32 %v187_v15, %v203_v16  ;;  %v208_v21 = vadd.s32 127, %v207_v17 }
 0x137   :  { %v206_v22 = vor.u32 %v205_v20, %v204_v18  ;;  %v209_v23 = vshll.u32 %v208_v21, 23 }
 0x139   :  { %v210_v24 = vor.u32 4788187, %v209_v23  ;;  %v213_v26 = vcvt.s32.f32 %v206_v22 }
 0x13b   :  { %v211_v25 = vand.u32 2147483647, %v210_v24 }
 0x13d   :  { %v214_v27 = vmul.f32 %v213_v26, %v211_v25 }
 0x13f   :  { %v215_v29 = vxor.u32 2147483648, %v214_v27 }
 0x141   :  { %v216_v30 = vsel %vm133_vm9, %v215_v29, %v214_v27 }
 0x142   :  { %v219_v32 = vsel %vm132_vm10, %v565_v11, %v216_v30 }
 0x143   :  { %419 = vcosq.f32 %v219_v32 }
 0x144   :  { %421 = vsinq.f32 %v219_v32 }
 0x14d   :  { %v420_v37 = vpop.eup %419 }
 0x14e   :  { %v422_v38 = vpop.eup %421  ;;  %v230_v39 = vxor.u32 2147483648, %v420_v37 }
 0x14f   :  { %v227_v40 = vxor.u32 2147483648, %v422_v38 }
 0x150   :  { %v337_v19 = vsel %vm335_vm13, %v230_v39, %v422_v38  ;;  %v231_v41 = vsel %vm229_vm11, %v230_v39, %v422_v38 }
 0x151   :  { %v334_v42 = vsel %vm332_vm15, %v420_v37, %v227_v40  ;;  %v228_v43 = vsel %vm226_vm14, %v420_v37, %v227_v40 }
 0x152   :  { %v338_v44 = vsel %vm331_vm1, %v334_v42, %v337_v19  ;;  %v232_v45 = vsel %vm225_vm0, %v228_v43, %v231_v41 }
 0x153   :  { %v339_v46 = vsel %vm223_vm2, nan, %v338_v44  ;;  %v233_v47 = vsel %vm223_vm2, nan, %v232_v45 }
 0x154   :  { %341 = vrot.lane.b32.xlu0 %v339_v46, %s502_s12  ;;  %235 = vst.msk [vmem:[#allocation7] sm:$0xff] %vm234_vm12, %v233_v47 }
 0x17b   :  { %v348_v49 = vpop.permute.xlu1 %347 }
 0x1c6   :  { %v342_v48 = vpop.permute.xlu0 %341 }
 0x1c7   :  { %345 = vst.msk [vmem:[#allocation7] sm:$0xff] %vm344_vm3, %v342_v48 }
 0x1c8   :  { %351 = vst.msk [vmem:[#allocation7] sm:$0xff] %vm350_vm4, %v348_v49 }
 0x1c9   :  { %478 = shalt.err (!%p475_p6)
}
 0x1ca   :  { %s479_s16 = scalar_lea.hbm %s605_s3, 128 }
 0x1cb   :  { %p480_p7 = scmp.ne.s32.totalorder %s605_s3, %s479_s16  ;;  %p483_p8 = scmp.lt.u32.totalorder %s479_s16, %s605_s3 }
 0x1cd   :  { %p485_p9 = pnand %p483_p8, %p480_p7 }
 0x1cf   :  { %488 = shalt.err (!%p485_p9)
}
 0x1d0   :  { %361 = dma.vmem_to_hbm [thread:$0]  %s359_s2, 128, %s605_s3, [#allocation4]  }
 0x1d1   :  { %493 = dma.done.wait [#allocation4], 128  }
 0x1d2   :  { %494 = vsyncadd [#allocation4], 4294967168 }
 0x1d3   :  { %365 = vsyncpa [#allocation3], 1 }
 0x1d4   :  { %366 = vsyncpa [#allocation6], 1 }
 0x1d5   :  { %367 = vsyncpa [#allocation4], 1 }

</bundles_post_ra>
